<compile_context>
chip_gen: v6e
topology: v6e:2x2x1
jax: 0.10.0
libtpu: 0.0.40
codegen_flags: <defaults>
</compile_context>

<pallas_src>
import functools

import jax
import jax.numpy as jnp
import numpy as np
from jax import lax
from jax.experimental import pallas as pl
from jax.experimental.pallas import tpu as pltpu


def _round_up(x, m):
    return (x + m - 1) // m * m


def _oim_ce_kernel(x_ref, wt_ref, tgt_ref, logits_ref, ce_ref,
                   m_sc, l_sc, t_sc, *, l_valid, tile_l, has_pad):
    """One (N-tile, L-tile) step: matmul + online logsumexp + target gather.

    `scalar` is already folded into x; W is pre-transposed (F, tile_l).
    """
    k = pl.program_id(1)

    @pl.when(k == 0)
    def _():
        m_sc[...] = jnp.full_like(m_sc, -jnp.inf)
        l_sc[...] = jnp.zeros_like(l_sc)
        t_sc[...] = jnp.zeros_like(t_sc)

    # (tile_n, F) bf16 @ (F, tile_l) bf16 -> f32 accumulation on the MXU.
    logits = lax.dot_general(
        x_ref[...], wt_ref[...],
        dimension_numbers=(((1,), (0,)), ((), ())),
        preferred_element_type=jnp.float32,
    )                                                    # (tile_n, tile_l) f32
    logits_ref[...] = logits.astype(logits_ref.dtype)    # bf16 HBM writeback

    # Global class index of each lane (needed for the target gather anyway).
    col = k * tile_l + lax.broadcasted_iota(jnp.int32, logits.shape, 1)

    if has_pad:
        # Single compare + select, reused by both max and exp (exp(-inf) == 0).
        logits_m = jnp.where(col < l_valid, logits, -jnp.inf)
    else:
        logits_m = logits

    # Online logsumexp (running max m, running sum l).
    tile_max = jnp.max(logits_m, axis=-1, keepdims=True)
    m_prev = m_sc[...]
    m_new = jnp.maximum(m_prev, tile_max)                # finite after tile 0
    alpha = jnp.exp(m_prev - m_new)                      # == 0 when m_prev == -inf
    l_sc[...] = alpha * l_sc[...] + jnp.sum(jnp.exp(logits_m - m_new),
                                            axis=-1, keepdims=True)
    m_sc[...] = m_new

    # Running target logit; ignored rows carry a -1 sentinel -> never match.
    t_sc[...] += jnp.sum(jnp.where(col == tgt_ref[...], logits, 0.0),
                         axis=-1, keepdims=True)

    @pl.when(k == pl.num_programs(1) - 1)
    def _():
        ce_ref[...] = m_sc[...] + jnp.log(l_sc[...]) - t_sc[...]


def oim_loss_part_bidirection(inputs, targets, pad_ratios_bidirection, part_idx,
                              lut_cq_t, num_labeled_pids, header_cq, *,
                              scalar=30.0, tile_n=256, tile_l=2048,
                              resident_l_max=4096):
    """Forward pass of OIMLoss_PartBidirection.

    `lut_cq_t` is the persistent OIM memory stored permanently stacked AND
    pre-transposed as a (num_features, num_labeled_pids + cq_size) bf16 buffer
    (built once, reused across steps).  Returns
    (loss, scaled_logits_bf16, new_targets, new_header_cq).
    """
    inputs = inputs.astype(jnp.float32)
    targets = targets.astype(jnp.int32)

    N, F = inputs.shape
    L = lut_cq_t.shape[1]
    cq_size = L - num_labeled_pids

    # ---- glue: visibility mask / target remapping (tiny elementwise JAX) ----
    n_part = 7.0
    uppad = pad_ratios_bidirection[:, 0].astype(jnp.float32)
    padr = pad_ratios_bidirection[:, 1].astype(jnp.float32)
    vis_part_up = n_part - jnp.ceil(n_part * (1.0 - uppad))
    vis_part_down = jnp.ceil(n_part * (1.0 - padr))
    pidx = part_idx.astype(jnp.float32)
    invis = (pidx > vis_part_down) | (pidx <= vis_part_up)
    unlab = targets < 0
    ignored = invis | unlab

    # new_targets: invisible / unlabeled samples -> 5555 (== CE ignore_index).
    new_targets = jnp.where(ignored, jnp.int32(5555), targets)
    # kernel-side targets: ignored -> -1 (never matches a class column, even
    # when L >= 5556).
    tgt_kernel = jnp.where(ignored, jnp.int32(-1), targets)

    # per-sample CE weight: class weight is 1 for labeled ids, 0 for cq slots;
    # ignore_index contributes to neither numerator nor denominator.
    sample_weight = ((new_targets >= 0)
                     & (new_targets < num_labeled_pids)).astype(jnp.float32)

    # ---- tile sizing (lane-dense, 128-aligned class tiles) ----
    n16 = _round_up(N, 16)
    tile_n = min(tile_n, n16)
    if n16 <= tile_n:
        # Would be a single N tile: split so both TensorCores (v7x) get work.
        tile_n = max(16, _round_up((n16 + 1) // 2, 16))
    n_pad = _round_up(N, tile_n)
    n_tiles_n = n_pad // tile_n

    l128 = _round_up(L, 128)
    tile_l = _round_up(min(tile_l, l128), 128)
    if l128 <= resident_l_max:
        tile_l = l128                       # W^T fully VMEM-resident, 1 L step
    l_pad = _round_up(L, tile_l)
    n_tiles_l = l_pad // tile_l
    has_pad = (l_pad != L)

    # ---- inputs: scalar pre-folded, bf16, padded ----
    x = (inputs * jnp.float32(scalar)).astype(jnp.bfloat16)
    if n_pad != N:
        x = jnp.pad(x, ((0, n_pad - N), (0, 0)))
    wt = lut_cq_t.astype(jnp.bfloat16)                   # no-op if already bf16
    if l_pad != L:
        wt = jnp.pad(wt, ((0, 0), (0, l_pad - L)))       # padded cols are zero
    tgt = tgt_kernel
    if n_pad != N:
        tgt = jnp.pad(tgt, ((0, n_pad - N),), constant_values=-1)
    tgt = tgt.reshape(n_pad, 1)

    kernel = functools.partial(_oim_ce_kernel, l_valid=int(L),
                               tile_l=int(tile_l), has_pad=bool(has_pad))

    # x is kept resident across the L axis (block index (i, 0) for every k), so
    # it is streamed once; W^T is streamed once total when it is resident.
    w_bytes = (1 if n_tiles_l == 1 else n_tiles_n) * l_pad * F * 2
    cost = pl.CostEstimate(
        flops=2 * n_pad * l_pad * F,
        transcendentals=n_pad * l_pad,
        bytes_accessed=(n_pad * F * 2            # x once
                        + w_bytes                # W^T
                        + n_pad * l_pad * 2      # bf16 logits writeback
                        + n_pad * 4              # targets
                        + n_pad * 4 * 2),        # ce out (+ slack)
    )

    # Double-buffered inputs + outputs + scratch; cap at ~70% of physical VMEM
    # (v7x only has 64 MiB per TC) and never above 48 MiB.
    vmem_bytes = (2 * tile_n * F * 2             # x
                  + 2 * F * tile_l * 2           # W^T
                  + 2 * tile_n * tile_l * 2      # bf16 logits out
                  + 2 * tile_n * 4               # targets
                  + 2 * tile_n * 4               # ce out
                  + 3 * tile_n * 4)              # scratch
    try:
        vmem_cap = int(pltpu.get_tpu_info().vmem_capacity_bytes)
    except Exception:
        vmem_cap = 64 << 20
    budget = min(48 << 20, int(0.7 * vmem_cap))
    vmem_limit = int(min(budget, max(16 << 20, 2 * vmem_bytes + (4 << 20))))

    logits_pad, ce_pad = pl.pallas_call(
        kernel,
        out_shape=(
            jax.ShapeDtypeStruct((n_pad, l_pad), jnp.bfloat16),
            jax.ShapeDtypeStruct((n_pad, 1), jnp.float32),
        ),
        grid_spec=pltpu.PrefetchScalarGridSpec(
            num_scalar_prefetch=0,
            grid=(n_tiles_n, n_tiles_l),                 # reduction (L) axis last
            in_specs=[
                pl.BlockSpec((tile_n, F), lambda i, k: (i, 0)),   # x (pre-scaled)
                pl.BlockSpec((F, tile_l), lambda i, k: (0, k)),   # W^T = [lut;cq]^T
                pl.BlockSpec((tile_n, 1), lambda i, k: (i, 0)),   # targets
            ],
            out_specs=(
                pl.BlockSpec((tile_n, tile_l), lambda i, k: (i, k)),  # bf16 logits
                pl.BlockSpec((tile_n, 1), lambda i, k: (i, 0)),       # per-row CE
            ),
            scratch_shapes=[
                pltpu.VMEM((tile_n, 1), jnp.float32),    # running max
                pltpu.VMEM((tile_n, 1), jnp.float32),    # running sum
                pltpu.VMEM((tile_n, 1), jnp.float32),    # running target logit
            ],
        ),
        compiler_params=pltpu.CompilerParams(
            dimension_semantics=("parallel", "arbitrary"),
            vmem_limit_bytes=vmem_limit,
        ),
        cost_estimate=cost,
    )(x, wt, tgt)

    logits = logits_pad[:N, :L]                          # bf16 scaled logits
    ce = ce_pad[:N, 0]

    # F.cross_entropy(weight, ignore_index=5555, size_average=True) with a
    # guard against an all-ignored batch (avoid 0/0 -> NaN).
    num = jnp.sum(sample_weight * ce)
    den = jnp.sum(sample_weight)
    loss = jnp.where(den > 0.0, num / jnp.where(den > 0.0, den, 1.0), 0.0)

    # header_cq bookkeeping: advances by the number of 5555 entries, matching
    # the reference forward's `(new_targets >= len(lut)).sum()`.
    new_header = (header_cq
                  + jnp.sum((new_targets >= num_labeled_pids).astype(jnp.int32))
                  ) % cq_size

    return loss, logits, new_targets, new_header


if __name__ == "__main__":
    # Small deterministic shapes consistent with the module (L not 128-aligned
    # on purpose, to exercise the class-padding path; N small enough to hit the
    # 2-N-tile megacore split).
    N = 24
    num_features = 128
    num_labeled_pids = 100
    cq_size = 1100                       # L = 1200 -> padded to 1280, resident W
    scalar = 30.0

    key = jax.random.PRNGKey(0)
    k_in, k_lut, k_cq, k_tgt, k_pad = jax.random.split(key, 5)

    inputs = jax.random.normal(k_in, (N, num_features), jnp.float32)
    inputs = inputs / jnp.linalg.norm(inputs, axis=-1, keepdims=True)

    lut = jax.random.normal(k_lut, (num_labeled_pids, num_features), jnp.float32)
    lut = lut / jnp.linalg.norm(lut, axis=-1, keepdims=True)
    cq = jax.random.normal(k_cq, (cq_size, num_features), jnp.float32)
    cq = cq / jnp.linalg.norm(cq, axis=-1, keepdims=True)

    # Persistent OIM memory kept permanently stacked, bf16 AND pre-transposed
    # (built once, not per step).
    lut_cq = jnp.concatenate([lut, cq], axis=0)
    lut_cq_t = lut_cq.T.astype(jnp.bfloat16)             # (F, L)

    targets = jax.random.randint(k_tgt, (N,), 0, num_labeled_pids).astype(jnp.int32)
    targets = targets.at[1].set(-1)
    targets = targets.at[5].set(-1)
    targets = targets.at[11].set(-1)

    pad_ratios_bidirection = jax.random.uniform(k_pad, (N, 2), jnp.float32) * 0.3
    part_idx = (jnp.arange(N, dtype=jnp.float32) % 7.0) + 1.0   # part indices 1..7

    header_cq = 0

    loss, logits, new_targets, new_header = jax.block_until_ready(
        oim_loss_part_bidirection(inputs, targets, pad_ratios_bidirection,
                                  part_idx, lut_cq_t, num_labeled_pids, header_cq,
                                  scalar=scalar))

    # ---- pure-JAX reference (same pre-scaled bf16 matmul / f32 softmax math) --
    L = num_labeled_pids + cq_size
    x_ref = (inputs * scalar).astype(jnp.bfloat16)
    logits_r = jnp.dot(x_ref, lut_cq.astype(jnp.bfloat16).T,
                       preferred_element_type=jnp.float32)
    uppad, padr = pad_ratios_bidirection[:, 0], pad_ratios_bidirection[:, 1]
    vis_up = 7.0 - jnp.ceil(7.0 * (1.0 - uppad))
    vis_down = jnp.ceil(7.0 * (1.0 - padr))
    invis_r = (part_idx > vis_down) | (part_idx <= vis_up)
    unlab_r = targets < 0
    nt_r = jnp.where(invis_r | unlab_r, jnp.int32(5555), targets)
    w_r = ((nt_r >= 0) & (nt_r < num_labeled_pids)).astype(jnp.float32)
    m_r = jnp.max(logits_r, axis=-1, keepdims=True)
    lse_r = (m_r + jnp.log(jnp.sum(jnp.exp(logits_r - m_r), axis=-1,
                                   keepdims=True)))[:, 0]
    safe_t = jnp.clip(nt_r, 0, L - 1)
    tgt_logit_r = jnp.take_along_axis(logits_r, safe_t[:, None], axis=1)[:, 0]
    ce_r = lse_r - tgt_logit_r
    loss_r = jnp.sum(w_r * ce_r) / jnp.maximum(jnp.sum(w_r), 1e-9)

    assert logits.shape == (N, L)
    assert logits.dtype == jnp.bfloat16
    assert bool(jnp.all(new_targets == nt_r))
    np.testing.assert_allclose(np.asarray(logits, dtype=np.float32),
                               np.asarray(logits_r),
                               atol=0.25, rtol=1e-2)      # bf16 logits writeback
    np.testing.assert_allclose(float(loss), float(loss_r), atol=2e-2, rtol=2e-3)
    assert jnp.isfinite(loss)
    print("KERNEL_OK")
</pallas_src>

<mosaic_0001>
module attributes {stable_mosaic.version = 11 : i64} {
  func.func @_oim_ce_kernel(%arg0: i32, %arg1: i32, %arg2: memref<16x128xbf16, #tpu.memory_space<vmem>>, %arg3: memref<128x1280xbf16, #tpu.memory_space<vmem>>, %arg4: memref<16x1xi32, #tpu.memory_space<vmem>>, %arg5: memref<16x1280xbf16, #tpu.memory_space<vmem>>, %arg6: memref<16x1xf32, #tpu.memory_space<vmem>>, %arg7: memref<16x1xf32, #tpu.memory_space<vmem>>, %arg8: memref<16x1xf32, #tpu.memory_space<vmem>>, %arg9: memref<16x1xf32, #tpu.memory_space<vmem>>) attributes {dimension_semantics = [#tpu.dimension_semantics<parallel>, #tpu.dimension_semantics<arbitrary>], iteration_bounds = array<i64: 2, 1>, scalar_prefetch = 0 : i64, scratch_operands = 3 : i64, tpu.core_type = #tpu.core_type<tc>, window_params = [{transform_indices = @transform_0, window_bounds = array<i64: 16, 128>}, {transform_indices = @transform_1, window_bounds = array<i64: 128, 1280>}, {transform_indices = @transform_2, window_bounds = array<i64: 16, 1>}, {transform_indices = @transform_3, window_bounds = array<i64: 16, 1280>}, {transform_indices = @transform_4, window_bounds = array<i64: 16, 1>}]} {
    %c0_i32 = arith.constant 0 : i32
    %0 = arith.cmpi eq, %arg1, %c0_i32 : i32
    %1 = arith.extui %0 : i1 to i32
    %c0_i32_0 = arith.constant 0 : i32
    %2 = arith.cmpi ne, %1, %c0_i32_0 : i32
    scf.if %2 {
      %cst_27 = arith.constant 0xFF800000 : f32
      %45 = vector.broadcast %cst_27 : f32 to vector<16x1xf32>
      %c0_28 = arith.constant 0 : index
      %c0_29 = arith.constant 0 : index
      %46 = vector.load %arg7[%c0_28, %c0_29] : memref<16x1xf32, #tpu.memory_space<vmem>>, vector<16x1xf32>
      tpu.vector_store %arg7[%c0_28, %c0_29], %45 {strides = array<i32>} : memref<16x1xf32, #tpu.memory_space<vmem>>, vector<16x1xf32>,
      %cst_30 = arith.constant 0.000000e+00 : f32
      %47 = vector.broadcast %cst_30 : f32 to vector<16x1xf32>
      %c0_31 = arith.constant 0 : index
      %c0_32 = arith.constant 0 : index
      %48 = vector.load %arg8[%c0_31, %c0_32] : memref<16x1xf32, #tpu.memory_space<vmem>>, vector<16x1xf32>
      tpu.vector_store %arg8[%c0_31, %c0_32], %47 {strides = array<i32>} : memref<16x1xf32, #tpu.memory_space<vmem>>, vector<16x1xf32>,
      %cst_33 = arith.constant 0.000000e+00 : f32
      %49 = vector.broadcast %cst_33 : f32 to vector<16x1xf32>
      %c0_34 = arith.constant 0 : index
      %c0_35 = arith.constant 0 : index
      %50 = vector.load %arg9[%c0_34, %c0_35] : memref<16x1xf32, #tpu.memory_space<vmem>>, vector<16x1xf32>
      tpu.vector_store %arg9[%c0_34, %c0_35], %49 {strides = array<i32>} : memref<16x1xf32, #tpu.memory_space<vmem>>, vector<16x1xf32>,
    } else {
    }
    %c0 = arith.constant 0 : index
    %c0_1 = arith.constant 0 : index
    %3 = vector.load %arg2[%c0, %c0_1] : memref<16x128xbf16, #tpu.memory_space<vmem>>, vector<16x128xbf16>
    %c0_2 = arith.constant 0 : index
    %c0_3 = arith.constant 0 : index
    %4 = vector.load %arg3[%c0_2, %c0_3] : memref<128x1280xbf16, #tpu.memory_space<vmem>>, vector<128x1280xbf16>
    %cst = arith.constant dense<0.000000e+00> : vector<16x1280xf32>
    %5 = tpu.matmul %3, %4, %cst {dimension_numbers = #tpu.dot_dimension_numbers<[1], [0], [0], [1], [0, 0, 1, 1], [], []>} : vector<16x128xbf16>, vector<128x1280xbf16>, vector<16x1280xf32> -> vector<16x1280xf32>
    %6 = arith.truncf %5 : vector<16x1280xf32> to vector<16x1280xbf16>
    %c0_4 = arith.constant 0 : index
    %c0_5 = arith.constant 0 : index
    %7 = vector.load %arg5[%c0_4, %c0_5] : memref<16x1280xbf16, #tpu.memory_space<vmem>>, vector<16x1280xbf16>
    tpu.vector_store %arg5[%c0_4, %c0_5], %6 {strides = array<i32>} : memref<16x1280xbf16, #tpu.memory_space<vmem>>, vector<16x1280xbf16>,
    %c1280_i32 = arith.constant 1280 : i32
    %8 = arith.muli %arg1, %c1280_i32 : i32
    %9 = tpu.iota {dimensions = array<i32: 1>} : vector<16x1280xi32>
    %10 = vector.broadcast %8 : i32 to vector<16x1280xi32>
    %11 = arith.addi %10, %9 : vector<16x1280xi32>
    %c1200_i32 = arith.constant 1200 : i32
    %12 = vector.broadcast %c1200_i32 : i32 to vector<16x1280xi32>
    %13 = arith.cmpi slt, %11, %12 : vector<16x1280xi32>
    %cst_6 = arith.constant 0xFF800000 : f32
    %14 = vector.broadcast %cst_6 : f32 to vector<16x1280xf32>
    %15 = arith.select %13, %5, %14 : vector<16x1280xi1>, vector<16x1280xf32>
    %cst_7 = arith.constant dense<0xFF800000> : vector<16xf32>
    %16 = vector.multi_reduction <maximumf>, %15, %cst_7 [1] : vector<16x1280xf32> to vector<16xf32>
    %17 = vector.shape_cast %16 : vector<16xf32> to vector<16x1xf32>
    %c0_8 = arith.constant 0 : index
    %c0_9 = arith.constant 0 : index
    %18 = vector.load %arg7[%c0_8, %c0_9] : memref<16x1xf32, #tpu.memory_space<vmem>>, vector<16x1xf32>
    %19 = arith.maximumf %18, %17 : vector<16x1xf32>
    %20 = arith.subf %18, %19 : vector<16x1xf32>
    %21 = math.exp %20 : vector<16x1xf32>
    %c0_10 = arith.constant 0 : index
    %c0_11 = arith.constant 0 : index
    %22 = vector.load %arg8[%c0_10, %c0_11] : memref<16x1xf32, #tpu.memory_space<vmem>>, vector<16x1xf32>
    %23 = arith.mulf %21, %22 : vector<16x1xf32>
    %24 = vector.broadcast %19 : vector<16x1xf32> to vector<16x1280xf32>
    %25 = arith.subf %15, %24 : vector<16x1280xf32>
    %26 = math.exp %25 : vector<16x1280xf32>
    %cst_12 = arith.constant dense<0.000000e+00> : vector<16xf32>
    %27 = vector.multi_reduction <add>, %26, %cst_12 [1] : vector<16x1280xf32> to vector<16xf32>
    %28 = vector.shape_cast %27 : vector<16xf32> to vector<16x1xf32>
    %29 = arith.addf %23, %28 : vector<16x1xf32>
    %c0_13 = arith.constant 0 : index
    %c0_14 = arith.constant 0 : index
    %30 = vector.load %arg8[%c0_13, %c0_14] : memref<16x1xf32, #tpu.memory_space<vmem>>, vector<16x1xf32>
    tpu.vector_store %arg8[%c0_13, %c0_14], %29 {strides = array<i32>} : memref<16x1xf32, #tpu.memory_space<vmem>>, vector<16x1xf32>,
    %c0_15 = arith.constant 0 : index
    %c0_16 = arith.constant 0 : index
    %31 = vector.load %arg7[%c0_15, %c0_16] : memref<16x1xf32, #tpu.memory_space<vmem>>, vector<16x1xf32>
    tpu.vector_store %arg7[%c0_15, %c0_16], %19 {strides = array<i32>} : memref<16x1xf32, #tpu.memory_space<vmem>>, vector<16x1xf32>,
    %c0_17 = arith.constant 0 : index
    %c0_18 = arith.constant 0 : index
    %32 = vector.load %arg9[%c0_17, %c0_18] : memref<16x1xf32, #tpu.memory_space<vmem>>, vector<16x1xf32>
    %c0_19 = arith.constant 0 : index
    %c0_20 = arith.constant 0 : index
    %33 = vector.load %arg4[%c0_19, %c0_20] : memref<16x1xi32, #tpu.memory_space<vmem>>, vector<16x1xi32>
    %34 = vector.broadcast %33 : vector<16x1xi32> to vector<16x1280xi32>
    %35 = arith.cmpi eq, %11, %34 : vector<16x1280xi32>
    %cst_21 = arith.constant 0.000000e+00 : f32
    %36 = vector.broadcast %cst_21 : f32 to vector<16x1280xf32>
    %37 = arith.select %35, %5, %36 : vector<16x1280xi1>, vector<16x1280xf32>
    %cst_22 = arith.constant dense<0.000000e+00> : vector<16xf32>
    %38 = vector.multi_reduction <add>, %37, %cst_22 [1] : vector<16x1280xf32> to vector<16xf32>
    %39 = vector.shape_cast %38 : vector<16xf32> to vector<16x1xf32>
    %40 = arith.addf %32, %39 : vector<16x1xf32>
    %c0_23 = arith.constant 0 : index
    %c0_24 = arith.constant 0 : index
    %41 = vector.load %arg9[%c0_23, %c0_24] : memref<16x1xf32, #tpu.memory_space<vmem>>, vector<16x1xf32>
    tpu.vector_store %arg9[%c0_23, %c0_24], %40 {strides = array<i32>} : memref<16x1xf32, #tpu.memory_space<vmem>>, vector<16x1xf32>,
    %c0_i32_25 = arith.constant 0 : i32
    %42 = arith.cmpi eq, %arg1, %c0_i32_25 : i32
    %43 = arith.extui %42 : i1 to i32
    %c0_i32_26 = arith.constant 0 : i32
    %44 = arith.cmpi ne, %43, %c0_i32_26 : i32
    scf.if %44 {
      %c0_27 = arith.constant 0 : index
      %c0_28 = arith.constant 0 : index
      %45 = vector.load %arg7[%c0_27, %c0_28] : memref<16x1xf32, #tpu.memory_space<vmem>>, vector<16x1xf32>
      %c0_29 = arith.constant 0 : index
      %c0_30 = arith.constant 0 : index
      %46 = vector.load %arg8[%c0_29, %c0_30] : memref<16x1xf32, #tpu.memory_space<vmem>>, vector<16x1xf32>
      %47 = math.log %46 : vector<16x1xf32>
      %48 = arith.addf %45, %47 : vector<16x1xf32>
      %c0_31 = arith.constant 0 : index
      %c0_32 = arith.constant 0 : index
      %49 = vector.load %arg9[%c0_31, %c0_32] : memref<16x1xf32, #tpu.memory_space<vmem>>, vector<16x1xf32>
      %50 = arith.subf %48, %49 : vector<16x1xf32>
      %c0_33 = arith.constant 0 : index
      %c0_34 = arith.constant 0 : index
      %51 = vector.load %arg6[%c0_33, %c0_34] : memref<16x1xf32, #tpu.memory_space<vmem>>, vector<16x1xf32>
      tpu.vector_store %arg6[%c0_33, %c0_34], %50 {strides = array<i32>} : memref<16x1xf32, #tpu.memory_space<vmem>>, vector<16x1xf32>,
    } else {
    }
    return
  }
  func.func @transform_0(%arg0: i32, %arg1: i32) -> (i32, i32) {
    %c0_i32 = arith.constant 0 : i32
    %c0_i32_0 = arith.constant 0 : i32
    return %arg0, %c0_i32 : i32, i32
  }
  func.func @transform_1(%arg0: i32, %arg1: i32) -> (i32, i32) {
    %c0_i32 = arith.constant 0 : i32
    %c0_i32_0 = arith.constant 0 : i32
    return %c0_i32, %arg1 : i32, i32
  }
  func.func @transform_2(%arg0: i32, %arg1: i32) -> (i32, i32) {
    %c0_i32 = arith.constant 0 : i32
    %c0_i32_0 = arith.constant 0 : i32
    return %arg0, %c0_i32 : i32, i32
  }
  func.func @transform_3(%arg0: i32, %arg1: i32) -> (i32, i32) {
    %c0_i32 = arith.constant 0 : i32
    return %arg0, %arg1 : i32, i32
  }
  func.func @transform_4(%arg0: i32, %arg1: i32) -> (i32, i32) {
    %c0_i32 = arith.constant 0 : i32
    %c0_i32_0 = arith.constant 0 : i32
    return %arg0, %c0_i32 : i32, i32
  }
}

</mosaic_0001>

<bundles_post_ra>
// kernel: tpu_custom_call.1
= control target key start
LH: loop header
LB: loop body
LE: loop exit
PB: predicated region body
PF: predicated region fallthrough
CT: control target
= control target key end

     0   :  { %10 = vsyncpa [#allocation6], 0  ;;  %s2420_s0 = inlined_call_operand.vmem [shape: bf16[32,128], index: 0, kind: input, shape index: {}]   ;;  %s2421_s1 = inlined_call_operand.hbm [shape: bf16[128,1280], index: 1, kind: input, shape index: {}]   ;;  %s2422_s2 = inlined_call_operand.vmem [shape: s32[32,1], index: 2, kind: input, shape index: {}]   ;;  %s2423_s3 = inlined_call_operand.hbm [shape: bf16[32,1280], index: 3, kind: output, shape index: {0}]   ;;  %s2424_s4 = inlined_call_operand.vmem [shape: f32[32,1], index: 4, kind: output, shape index: {1}]  }
   0x1   :  { %11 = vsyncpa [#allocation7], 0 }
   0x2   :  { %13 = vsyncpa [#allocation7 + $0x1], 0  ;;  %s1999_s15 = smov 0   ;;  %s2001_s16 = smov 0  }
   0x3   :  { %s2003_s17 = smov 0   ;;  %s2005_s18 = smov 0  }
   0x4   :  { %s2007_s19 = smov 0   ;;  %s2009_s20 = smov 0  }
   0x5 LB: > { %s1492_s21 = sadd.s32 4294967295, %s1963_s20   ;;  %s1493_s22 = sadd.s32 4294967294, %s1963_s20   ;;  %s1963_s20 = sphi %s2009_s20, %s19_s20   ;;  %s1959_s19 = sphi %s2007_s19, %s2433_s19   ;;  %s1955_s18 = sphi %s2005_s18, %s2432_s18   ;;  %s1951_s17 = sphi %s2003_s17, %s2431_s17   ;;  %s1947_s16 = sphi %s2001_s16, %s2430_s16   ;;  %s1943_s15 = sphi %s1999_s15, %s2429_s15  }
   0x6   : > { %s31_s23 = sadd.s32 1, %s1959_s19  ;;  %s118_s24 = sadd.s32 1, %s1951_s17 }
   0x7   : > { %p33_p0 = scmp.ge.s32.totalorder %s31_s23, 2  ;;  %p128_p1 = scmp.ne.s32.totalorder %s1951_s17, %s1947_s16 }
   0x8   : > { %p129_p2 = scmp.eq.s32.totalorder %s1492_s21, 1  ;;  %p134_p3 = scmp.ne.s32.totalorder %s1947_s16, %s1943_s15 }
   0x9   : > { %s2435_s23 = smov (%p33_p0, %s31_s23), 0  ;;  %p135_p5 = scmp.eq.s32.totalorder %s1493_s22, 1 }
   0xa   : > { %p2039_p4 = por %p129_p2, %p128_p1  ;;  %s113_s26 = ssub.s32 %s1959_s19, %s2435_s23 }
   0xb   : > { %p1494_p6 = scmp.ge.s32.totalorder %s1963_s20, 1  ;;  %p116_p7 = scmp.eq.s32.totalorder %s113_s26, 0 }
   0xc   : > { %p2046_p8 = por %p135_p5, %p134_p3  ;;  %p168_p9 = scmp.lt.s32.totalorder %s1963_s20, 3 }
   0xd   : > { %s2052_s28 = scalar_select %p116_p7, %s1951_s17, %s118_s24  }
   0xe   : > { %p2054_p10 = pnand %p1494_p6, %p168_p9  ;;  %p2058_p11 = scmp.eq.s32.totalorder %s1492_s21, 0 }
   0xf   : > { %s1965_s5 = smov [#allocation5]  }
  0x10   : > { %p1619_p12 = pneg %p2054_p10  ;;  %s183_s6 = sshll.u32 %s1965_s5, 4  ;;  %s184_s6 = int_to_ptr.vmem [resolvable:$true] %s183_s6 }
  0x11   : > { %s1868_s7 = scalar_lea.vmem %s184_s6, 10240  ;;  %p1876_p5 = scmp.lt.s32.totalorder %s184_s6, %s184_s6 }
  0x12   : > { %p1620_p13 = pnand %p2058_p11, %p1619_p12  ;;  %p1869_p1 = scmp.ne.s32.totalorder %s184_s6, %s1868_s7 }
  0x13   : > { %p1877_p6 = scmp.lt.s32.totalorder %s1868_s7, %s1868_s7 }
  0x14   : > { %p1859_p0 = pneg %p1620_p13 }
  0x15   : > { %p1878_p7 = por %p1877_p6, %p1876_p5 }
  0x16   : > { %p1871_p2 = pnand %p1869_p1, %p1859_p0 }
  0x18   : > { %p1872_p3 = pneg %p1871_p2 }
  0x1a   : > { %p1879_p9 = pnand %p1878_p7, %p1872_p3 }
  0x1c   : > { %1882 = shalt.err (!%p1879_p9)
}
  0x1d   : > { %s1966_s8 = smov 640   ;;  %s1967_s9 = smov 40  }
  0x1e   : > { %1622 = dma.hbm_to_vmem [thread:$0]  (!%p1620_p13), %s2421_s1, 10240, %s184_s6, [#allocation6], %s1966_s8, %s1966_s8, %s1967_s9  }
  0x1f   : > { %217 = sbr.rel (%p2054_p10) target bundleno = 812 (0x32c), region = 32 }
  0x24   : > { %1934 = dma.done.wait (%p2058_p11), [#allocation6], 10240  }
  0x25   : > { %1936 = vsyncadd (%p2058_p11), [#allocation6], 4294957056  ;;  %v1968_v0 = vmov 0   ;;  %v1688_v1 = vld [vmem:[#allocation5 + $0x234] ss:$40 sps:$4 sm:$0xff]   ;;  %s1499_s12 = sshll.u32 %s1955_s18, 1 }
  0x26   : > { %806 = vmatprep.mubr.bf16.mxu0 %v1968_v0  ;;  %849 = vmatprep.mubr.bf16.mxu1 %v1968_v0  ;;  %v1690_v2 = vld [vmem:[#allocation5 + $0x23c] ss:$40 sps:$4 sm:$0xff]   ;;  %v1692_v3 = vld [vmem:[#allocation5 + $0x230] ss:$40 sps:$4 sm:$0xff]   ;;  %v1696_v6 = vld [vmem:[#allocation5 + $0x1ec] ss:$40 sps:$4 sm:$0xff]  }
  0x27   : > { %1687 = vset.pattern.permute.xlu0 %v1968_v0  ;;  %1686 = vset.pattern.permute.xlu1 %v1968_v0  ;;  %v1693_v4 = vld [vmem:[#allocation5 + $0x238] ss:$40 sps:$4 sm:$0xff]   ;;  %v1694_v5 = vld [vmem:[#allocation5 + $0x1e4] ss:$40 sps:$4 sm:$0xff]   ;;  %v1699_v8 = vld [vmem:[#allocation5 + $0x1e8] ss:$40 sps:$4 sm:$0xff]  }
  0x28   : > { %774 = vmatprep.subr.bf16.mxu0 %v1688_v1  ;;  %817 = vmatprep.subr.bf16.mxu1 %v1690_v2  ;;  %v1698_v7 = vld [vmem:[#allocation5 + $0x1e0] ss:$40 sps:$4 sm:$0xff]   ;;  %v1700_v9 = vld [vmem:[#allocation5 + $0x194] ss:$40 sps:$4 sm:$0xff]   ;;  %v1704_v11 = vld [vmem:[#allocation5 + $0x190] ss:$40 sps:$4 sm:$0xff]  }
  0x29   : > { %775 = vmatpush1.bf16.msra.mxu0 %v1692_v3  ;;  %818 = vmatpush1.bf16.msra.mxu1 %v1693_v4  ;;  %v1702_v10 = vld [vmem:[#allocation5 + $0x19c] ss:$40 sps:$4 sm:$0xff]   ;;  %v1705_v12 = vld [vmem:[#allocation5 + $0x198] ss:$40 sps:$4 sm:$0xff]   ;;  %v1708_v14 = vld [vmem:[#allocation5 + $0x14c] ss:$40 sps:$4 sm:$0xff]  }
  0x2a   : > { %776 = vmatprep.subr.bf16.mxu0 %v1694_v5  ;;  %819 = vmatprep.subr.bf16.mxu1 %v1696_v6  ;;  %v1706_v13 = vld [vmem:[#allocation5 + $0x144] ss:$40 sps:$4 sm:$0xff]   ;;  %p254_p10 = scmp.lt.s32.totalorder %s1499_s12, 3  ;;  %v1710_v15 = vld [vmem:[#allocation5 + $0x140] ss:$40 sps:$4 sm:$0xff]   ;;  %vm279_vm0 = vcmask 7168  }
  0x2b   : > { %v1711_v16 = vld [vmem:[#allocation5 + $0x148] ss:$40 sps:$4 sm:$0xff]   ;;  %v1712_v17 = vld [vmem:[#allocation5 + $0xf4] ss:$40 sps:$4 sm:$0xff]   ;;  %v1717_v20 = vld [vmem:[#allocation5 + $0xf8] ss:$40 sps:$4 sm:$0xff]  }
  0x2c   : > { %v1714_v18 = vld [vmem:[#allocation5 + $0xfc] ss:$40 sps:$4 sm:$0xff]   ;;  %s2437_s12 = smov (!%p254_p10, %s1499_s12), 3  ;;  %v1716_v19 = vld [vmem:[#allocation5 + $0xf0] ss:$40 sps:$4 sm:$0xff]   ;;  %s243_s24 = sand.u32 1, %s1947_s16  }
  0x2d   : > { %777 = vmatpush1.bf16.msra.mxu0 %v1698_v7  ;;  %820 = vmatpush1.bf16.msra.mxu1 %v1699_v8  ;;  %v1718_v21 = vld [vmem:[#allocation5 + $0xa4] ss:$40 sps:$4 sm:$0xff]   ;;  %s1500_s13 = sshll.u32 %s2437_s12, 2  ;;  %v1722_v23 = vld [vmem:[#allocation5 + $0xa0] ss:$40 sps:$4 sm:$0xff]   ;;  %s1611_s26 = smul.u32 80, %s243_s24 }
  0x2e   : > { %778 = vmatprep.subr.bf16.mxu0 %v1700_v9  ;;  %821 = vmatprep.subr.bf16.mxu1 %v1702_v10  ;;  %v1720_v22 = vld [vmem:[#allocation5 + $0xac] ss:$40 sps:$4 sm:$0xff]   ;;  %v1723_v24 = vld [vmem:[#allocation5 + $0xa8] ss:$40 sps:$4 sm:$0xff]   ;;  %s257_s22 = scalar_lea.vmem %s2420_s0, %s1500_s13  ;;  %v1726_v26 = vld [vmem:[#allocation5 + $0x5c] ss:$40 sps:$4 sm:$0xff]  }
  0x2f   : > { %v1724_v25 = vld [vmem:[#allocation5 + $0x54] ss:$40 sps:$4 sm:$0xff]   ;;  %v1728_v27 = vld [vmem:[#allocation5 + $0x50] ss:$40 sps:$4 sm:$0xff]   ;;  %v1730_v29 = vld [vmem:[#allocation5 + $0x4] ss:$40 sps:$4 sm:$0xff]  }
  0x30   : > { %v1729_v28 = vld [vmem:[#allocation5 + $0x58] ss:$40 sps:$4 sm:$0xff]   ;;  %v1732_v30 = vld [vmem:[#allocation5 + $0xc] ss:$40 sps:$4 sm:$0xff]   ;;  %v1735_v32 = vld [vmem:[#allocation5 + $0x8] ss:$40 sps:$4 sm:$0xff]  }
  0x31   : > { %779 = vmatpush1.bf16.msra.mxu0 %v1704_v11  ;;  %822 = vmatpush1.bf16.msra.mxu1 %v1705_v12  ;;  %v1734_v31 = vld [vmem:[#allocation5] ss:$40 sps:$4 sm:$0xff]   ;;  %v1739_v33 = vld [vmem:[#allocation5 + $0x244] ss:$40 sps:$4 sm:$0xff]   ;;  %v2086_v35 = vld [vmem:[%s257_s22] sm:$0xff]   ;;  %s2117_s29 = scalar_lea.vmem [#allocation8], %s1611_s26 }
  0x32   : > { %780 = vmatprep.subr.bf16.mxu0 %v1706_v13  ;;  %823 = vmatprep.subr.bf16.mxu1 %v1708_v14  ;;  %v1742_v34 = vld [vmem:[#allocation5 + $0x24c] ss:$40 sps:$4 sm:$0xff]   ;;  %v1737_v36 = vld [vmem:[#allocation5 + $0x240] ss:$40 sps:$4 sm:$0xff]   ;;  %v1748_v39 = vld [vmem:[#allocation5 + $0x1fc] ss:$40 sps:$4 sm:$0xff]  }
  0x33   : > { %v1740_v37 = vld [vmem:[#allocation5 + $0x248] ss:$40 sps:$4 sm:$0xff]   ;;  %v1745_v38 = vld [vmem:[#allocation5 + $0x1f4] ss:$40 sps:$4 sm:$0xff]   ;;  %v1746_v41 = vld [vmem:[#allocation5 + $0x1f8] ss:$40 sps:$4 sm:$0xff]  }
  0x34   : > { %v1743_v40 = vld [vmem:[#allocation5 + $0x1f0] ss:$40 sps:$4 sm:$0xff]   ;;  %v1751_v42 = vld [vmem:[#allocation5 + $0x1a4] ss:$40 sps:$4 sm:$0xff]   ;;  %v1749_v44 = vld [vmem:[#allocation5 + $0x1a0] ss:$40 sps:$4 sm:$0xff]  }
  0x35   : > { %781 = vmatpush1.bf16.msra.mxu0 %v1710_v15  ;;  %824 = vmatpush1.bf16.msra.mxu1 %v1711_v16  ;;  %v1754_v43 = vld [vmem:[#allocation5 + $0x1ac] ss:$40 sps:$4 sm:$0xff]   ;;  %v1752_v45 = vld [vmem:[#allocation5 + $0x1a8] ss:$40 sps:$4 sm:$0xff]   ;;  %v1760_v47 = vld [vmem:[#allocation5 + $0x15c] ss:$40 sps:$4 sm:$0xff]  }
  0x36   : > { %782 = vmatprep.subr.bf16.mxu0 %v1712_v17  ;;  %825 = vmatprep.subr.bf16.mxu1 %v1714_v18  ;;  %v1757_v46 = vld [vmem:[#allocation5 + $0x154] ss:$40 sps:$4 sm:$0xff]   ;;  %v1755_v48 = vld [vmem:[#allocation5 + $0x150] ss:$40 sps:$4 sm:$0xff]   ;;  %v1763_v50 = vld [vmem:[#allocation5 + $0x104] ss:$40 sps:$4 sm:$0xff]  }
  0x37   : > { %v1758_v49 = vld [vmem:[#allocation5 + $0x158] ss:$40 sps:$4 sm:$0xff]   ;;  %v1766_v51 = vld [vmem:[#allocation5 + $0x10c] ss:$40 sps:$4 sm:$0xff]   ;;  %v1764_v53 = vld [vmem:[#allocation5 + $0x108] ss:$40 sps:$4 sm:$0xff]  }
  0x38   : > { %v1761_v52 = vld [vmem:[#allocation5 + $0x100] ss:$40 sps:$4 sm:$0xff]   ;;  %v1769_v54 = vld [vmem:[#allocation5 + $0xb4] ss:$40 sps:$4 sm:$0xff]   ;;  %v1767_v56 = vld [vmem:[#allocation5 + $0xb0] ss:$40 sps:$4 sm:$0xff]  }
  0x39   : > { %783 = vmatpush1.bf16.msra.mxu0 %v1716_v19  ;;  %826 = vmatpush1.bf16.msra.mxu1 %v1717_v20  ;;  %v1772_v55 = vld [vmem:[#allocation5 + $0xbc] ss:$40 sps:$4 sm:$0xff]   ;;  %v1770_v57 = vld [vmem:[#allocation5 + $0xb8] ss:$40 sps:$4 sm:$0xff]   ;;  %v1778_v59 = vld [vmem:[#allocation5 + $0x6c] ss:$40 sps:$4 sm:$0xff]  }
  0x3a   : > { %784 = vmatprep.subr.bf16.mxu0 %v1718_v21  ;;  %827 = vmatprep.subr.bf16.mxu1 %v1720_v22  ;;  %v1775_v58 = vld [vmem:[#allocation5 + $0x64] ss:$40 sps:$4 sm:$0xff]   ;;  %v1773_v60 = vld [vmem:[#allocation5 + $0x60] ss:$40 sps:$4 sm:$0xff]   ;;  %v1781_v62 = vld [vmem:[#allocation5 + $0x14] ss:$40 sps:$4 sm:$0xff]  }
  0x3b   : > { %v1776_v61 = vld [vmem:[#allocation5 + $0x68] ss:$40 sps:$4 sm:$0xff]   ;;  %v1784_v63 = vld [vmem:[#allocation5 + $0x1c] ss:$40 sps:$4 sm:$0xff]   ;;  %v1782_v2 = vld [vmem:[#allocation5 + $0x18] ss:$40 sps:$4 sm:$0xff]  }
  0x3c   : > { %v1779_v1 = vld [vmem:[#allocation5 + $0x10] ss:$40 sps:$4 sm:$0xff]   ;;  %v1787_v3 = vld [vmem:[#allocation5 + $0x254] ss:$40 sps:$4 sm:$0xff]   ;;  %v1790_v5 = vld [vmem:[#allocation5 + $0x204] ss:$40 sps:$4 sm:$0xff]  }
  0x3d   : > { %785 = vmatpush1.bf16.msra.mxu0 %v1722_v23  ;;  %828 = vmatpush1.bf16.msra.mxu1 %v1723_v24  ;;  %v1785_v4 = vld [vmem:[#allocation5 + $0x250] ss:$40 sps:$4 sm:$0xff]   ;;  %v1788_v6 = vld [vmem:[#allocation5 + $0x200] ss:$40 sps:$4 sm:$0xff]   ;;  %v1793_v7 = vld [vmem:[#allocation5 + $0x1b4] ss:$40 sps:$4 sm:$0xff]  }
  0x3e   : > { %786 = vmatprep.subr.bf16.mxu0 %v1724_v25  ;;  %829 = vmatprep.subr.bf16.mxu1 %v1726_v26  ;;  %v1791_v8 = vld [vmem:[#allocation5 + $0x1b0] ss:$40 sps:$4 sm:$0xff]   ;;  %v1796_v9 = vld [vmem:[#allocation5 + $0x164] ss:$40 sps:$4 sm:$0xff]   ;;  %v1794_v10 = vld [vmem:[#allocation5 + $0x160] ss:$40 sps:$4 sm:$0xff]  }
  0x3f   : > { %v1799_v11 = vld [vmem:[#allocation5 + $0x114] ss:$40 sps:$4 sm:$0xff]   ;;  %v1797_v12 = vld [vmem:[#allocation5 + $0x110] ss:$40 sps:$4 sm:$0xff]   ;;  %v1802_v13 = vld [vmem:[#allocation5 + $0xc4] ss:$40 sps:$4 sm:$0xff]  }
  0x40   : > { %v1800_v14 = vld [vmem:[#allocation5 + $0xc0] ss:$40 sps:$4 sm:$0xff]   ;;  %v1803_v15 = vld [vmem:[#allocation5 + $0x70] ss:$40 sps:$4 sm:$0xff]   ;;  %v1808_v16 = vld [vmem:[#allocation5 + $0x24] ss:$40 sps:$4 sm:$0xff]  }
  0x41   : > { %787 = vmatpush1.bf16.msra.mxu0 %v1728_v27  ;;  %830 = vmatpush1.bf16.msra.mxu1 %v1729_v28  ;;  %v1806_v17 = vld [vmem:[#allocation5 + $0x20] ss:$40 sps:$4 sm:$0xff]   ;;  %v1969_v18 = vmov -inf   ;;  %s1502_s30 = sshll.u32 %s2437_s12, 3  ;;  %s1612_s8 = smul.u32 1280, %s1955_s18 }
  0x42   : > { %788 = vmatprep.subr.bf16.mxu0 %v1730_v29  ;;  %831 = vmatprep.subr.bf16.mxu1 %v1732_v30  ;;  %280 = vst.msk [vmem:[#allocation2] sm:$0xff] %vm279_vm0, %v1969_v18  ;;  %281 = vst.msk [vmem:[#allocation2 + $0x8] sm:$0xff] %vm279_vm0, %v1969_v18  ;;  %s264_s7 = scalar_lea.vmem %s2422_s2, %s1502_s30  ;;  %s1364_s9 = sshll.u32 %s2117_s29, 4  ;;  %s2350_s9 = int_to_ptr.vmem [resolvable:$true] %s1364_s9 }
  0x43   : > { %v1250_v18 = vld [vmem:[%s264_s7 + $0x8] sm:$0xff]  ;;  %s2355_s13 = scalar_lea.hbm %s2423_s3, %s1612_s8  ;;  %s2359_s14 = scalar_lea.sflag [#allocation7], %s243_s24 }
  0x44   : > { %s1883_s21 = scalar_lea.vmem %s2350_s9, 1280  ;;  %s1971_s18 = smov [#allocation8]  }
  0x45   : > { %789 = vmatpush1.bf16.msra.mxu0 %v1734_v31  ;;  %832 = vmatpush1.bf16.msra.mxu1 %v1735_v32  ;;  %p1884_p11 = scmp.ne.s32.totalorder %s2350_s9, %s1883_s21  ;;  %s1887_s22 = sshll.u32 %s1971_s18, 4  ;;  %s1888_s22 = int_to_ptr.vmem [resolvable:$false] %s1887_s22 }
  0x46   : > { %860 = vmatprep.subr.bf16.mxu0 %v1739_v33  ;;  %903 = vmatprep.subr.bf16.mxu1 %v1742_v34  ;;  %s1889_s26 = scalar_lea.vmem %s1888_s22, 2560  ;;  %p1890_p0 = scmp.lt.s32.totalorder %s2350_s9, %s1888_s22 }
  0x47   : > { %p1885_p12 = pnand %p1884_p11, %p2039_p4  ;;  %p1891_p1 = scmp.lt.s32.totalorder %s1889_s26, %s1883_s21 }
  0x48   : > { %807 = vmatmul.mubr.bf16.vlgmr.msra.gmra.mxu0 %v2086_v35  ;;  %850 = vmatmul.mubr.bf16.vlgmr.msra.gmra.mxu1 %v2086_v35 }
  0x49   : > { %861 = vmatpush1.bf16.msra.mxu0 %v1737_v36  ;;  %904 = vmatpush1.bf16.msra.mxu1 %v1740_v37  ;;  %p1886_p13 = pneg %p1885_p12  ;;  %p1892_p2 = por %p1891_p1, %p1890_p0 }
  0x4a   : > { %862 = vmatprep.subr.bf16.mxu0 %v1745_v38  ;;  %905 = vmatprep.subr.bf16.mxu1 %v1748_v39 }
  0x4b   : > { %892 = vmatprep.mubr.bf16.mxu0 %v1968_v0  ;;  %935 = vmatprep.mubr.bf16.mxu1 %v1968_v0  ;;  %p1893_p3 = pnand %p1892_p2, %p1886_p13 }
  0x4d   : > { %863 = vmatpush1.bf16.msra.mxu0 %v1743_v40  ;;  %906 = vmatpush1.bf16.msra.mxu1 %v1746_v41 }
  0x4e   : > { %864 = vmatprep.subr.bf16.mxu0 %v1751_v42  ;;  %907 = vmatprep.subr.bf16.mxu1 %v1754_v43  ;;  %v1060_v43 = vlaneseq }
  0x51   : > { %865 = vmatpush1.bf16.msra.mxu0 %v1749_v44  ;;  %908 = vmatpush1.bf16.msra.mxu1 %v1752_v45  ;;  %v2159_v44 = vand.u32 127, %v1060_v43 }
  0x52   : > { %866 = vmatprep.subr.bf16.mxu0 %v1757_v46  ;;  %909 = vmatprep.subr.bf16.mxu1 %v1760_v47 }
  0x53   : > { %v2166_v47 = vadd.s32 1152, %v2159_v44 }
  0x55   : > { %867 = vmatpush1.bf16.msra.mxu0 %v1755_v48  ;;  %910 = vmatpush1.bf16.msra.mxu1 %v1758_v49  ;;  %vm1091_vm1 = vcmp.lt.s32.totalorder %v2166_v47, 1200 }
  0x56   : > { %868 = vmatprep.subr.bf16.mxu0 %v1763_v50  ;;  %911 = vmatprep.subr.bf16.mxu1 %v1766_v51 }
  0x59   : > { %869 = vmatpush1.bf16.msra.mxu0 %v1761_v52  ;;  %912 = vmatpush1.bf16.msra.mxu1 %v1764_v53 }
  0x5a   : > { %870 = vmatprep.subr.bf16.mxu0 %v1769_v54  ;;  %913 = vmatprep.subr.bf16.mxu1 %v1772_v55 }
  0x5d   : > { %871 = vmatpush1.bf16.msra.mxu0 %v1767_v56  ;;  %914 = vmatpush1.bf16.msra.mxu1 %v1770_v57 }
  0x5e   : > { %872 = vmatprep.subr.bf16.mxu0 %v1775_v58  ;;  %915 = vmatprep.subr.bf16.mxu1 %v1778_v59 }
  0x61   : > { %873 = vmatpush1.bf16.msra.mxu0 %v1773_v60  ;;  %916 = vmatpush1.bf16.msra.mxu1 %v1776_v61 }
  0x62   : > { %874 = vmatprep.subr.bf16.mxu0 %v1781_v62  ;;  %917 = vmatprep.subr.bf16.mxu1 %v1784_v63 }
  0x65   : > { %875 = vmatpush1.bf16.msra.mxu0 %v1779_v1  ;;  %918 = vmatpush1.bf16.msra.mxu1 %v1782_v2 }
  0x66   : > { %946 = vmatprep.subr.bf16.mxu0 %v1787_v3 }
  0x68   : > { %893 = vmatmul.mubr.bf16.vlgmr.msra.gmra.mxu0 %v2086_v35  ;;  %936 = vmatmul.mubr.bf16.vlgmr.msra.gmra.mxu1 %v2086_v35 }
  0x69   : > { %947 = vmatpush1.bf16.msra.mxu0 %v1785_v4  ;;  %978 = vmatprep.mubr.bf16.mxu0 %v1968_v0  ;;  %v1805_v0 = vld [vmem:[#allocation5 + $0x74] ss:$40 sps:$4 sm:$0xff]  }
  0x6a   : > { %948 = vmatprep.subr.bf16.mxu0 %v1790_v5 }
  0x6d   : > { %949 = vmatpush1.bf16.msra.mxu0 %v1788_v6 }
  0x6e   : > { %950 = vmatprep.subr.bf16.mxu0 %v1793_v7 }
  0x71   : > { %951 = vmatpush1.bf16.msra.mxu0 %v1791_v8 }
  0x72   : > { %952 = vmatprep.subr.bf16.mxu0 %v1796_v9  ;;  %v1249_v9 = vld [vmem:[%s264_s7] sm:$0xff] }
  0x75   : > { %953 = vmatpush1.bf16.msra.mxu0 %v1794_v10  ;;  %v1970_v10 = vmov 0.0  }
  0x76   : > { %954 = vmatprep.subr.bf16.mxu0 %v1799_v11  ;;  %284 = vst.msk [vmem:[#allocation4] sm:$0xff] %vm279_vm0, %v1970_v10  ;;  %282 = vst.msk [vmem:[#allocation3] sm:$0xff] %vm279_vm0, %v1970_v10  ;;  %v2219_v11 = vld [vmem:[#allocation2] sm:$0xff] }
  0x77   : > { %283 = vst.msk [vmem:[#allocation3 + $0x8] sm:$0xff] %vm279_vm0, %v1970_v10  ;;  %285 = vst.msk [vmem:[#allocation4 + $0x8] sm:$0xff] %vm279_vm0, %v1970_v10 }
  0x79   : > { %955 = vmatpush1.bf16.msra.mxu0 %v1797_v12 }
  0x7a   : > { %956 = vmatprep.subr.bf16.mxu0 %v1802_v13 }
  0x7d   : > { %957 = vmatpush1.bf16.msra.mxu0 %v1800_v14  ;;  %v2224_v14 = vld [vmem:[#allocation2 + $0x8] sm:$0xff] }
  0x7e   : > { %958 = vmatprep.subr.bf16.mxu0 %v1805_v0 }
  0x81   : > { %959 = vmatpush1.bf16.msra.mxu0 %v1803_v15 }
  0x82   : > { %960 = vmatprep.subr.bf16.mxu0 %v1808_v16 }
  0x85   : > { %961 = vmatpush1.bf16.msra.mxu0 %v1806_v17 }
  0x88   : > { %979 = vmatmul.mubr.bf16.vlgmr.msra.gmra.mxu0 %v2086_v35 }
 0x108   : > { %v2101_v19 = vpop.f32.mrf.mxu0  ;;  %v2103_v20 = vpop.f32.mrf.mxu1 }
 0x109   : > { %v1112_v45 = vmax.f32 %v2101_v19, %v2103_v20 }
 0x10a   : > { %v2105_v21 = vpop.f32.mrf.mxu0  ;;  %v2107_v22 = vpop.f32.mrf.mxu1 }
 0x10b   : > { %v1601_v23 = vpack.c.bf16 %v2105_v21, %v2101_v19  ;;  %v1602_v24 = vpack.c.bf16 %v2107_v22, %v2103_v20  ;;  %v1113_v46 = vmax.f32 %v2105_v21, %v2107_v22 }
 0x10c   : > { %v2113_v25 = vpop.f32.mrf.mxu0  ;;  %v2115_v26 = vpop.f32.mrf.mxu1 }
 0x10d   : > { %1049 = vst [vmem:[%s2117_s29] sm:$0xff] %v1601_v23  ;;  %1050 = vst [vmem:[%s2117_s29 + $0x8] sm:$0xff] %v1602_v24  ;;  %v1123_v50 = vmax.f32 %v2113_v25, %v2115_v26  ;;  %v2240_v23 = vadd.s32 128, %v2159_v44 }
 0x10e   : > { %v2121_v27 = vpop.f32.mrf.mxu0  ;;  %v2123_v28 = vpop.f32.mrf.mxu1 }
 0x10f   : > { %v1606_v29 = vpack.c.bf16 %v2121_v27, %v2113_v25  ;;  %v1607_v30 = vpack.c.bf16 %v2123_v28, %v2115_v26  ;;  %v1124_v51 = vmax.f32 %v2121_v27, %v2123_v28 }
 0x111   : > { %1054 = vst [vmem:[%s2117_s29 + $0x28] sm:$0xff] %v1606_v29  ;;  %1055 = vst [vmem:[%s2117_s29 + $0x30] sm:$0xff] %v1607_v30  ;;  %v2243_v29 = vadd.s32 256, %v2159_v44  ;;  %v2248_v30 = vadd.s32 384, %v2159_v44 }
 0x128   : > { %v2131_v31 = vpop.f32.mrf.mxu0  ;;  %v2133_v32 = vpop.f32.mrf.mxu1 }
 0x129   : > { %v1114_v48 = vmax.f32 %v1112_v45, %v2131_v31 }
 0x12a   : > { %v2135_v33 = vpop.f32.mrf.mxu0  ;;  %v2137_v34 = vpop.f32.mrf.mxu1 }
 0x12b   : > { %v1603_v35 = vpack.c.bf16 %v2135_v33, %v2131_v31  ;;  %v1604_v36 = vpack.c.bf16 %v2137_v34, %v2133_v32  ;;  %v1115_v49 = vmax.f32 %v1113_v46, %v2135_v33  ;;  %v1116_v56 = vmax.f32 %v1114_v48, %v2133_v32 }
 0x12c   : > { %v2143_v37 = vpop.f32.mrf.mxu0  ;;  %v2145_v38 = vpop.f32.mrf.mxu1  ;;  %v2262_v46 = vadd.s32 768, %v2159_v44 }
 0x12d   : > { %1051 = vst [vmem:[%s2117_s29 + $0x10] sm:$0xff] %v1603_v35  ;;  %1052 = vst [vmem:[%s2117_s29 + $0x18] sm:$0xff] %v1604_v36  ;;  %v1125_v53 = vmax.f32 %v1123_v50, %v2143_v37  ;;  %v1117_v57 = vmax.f32 %v1115_v49, %v2137_v34  ;;  %v2267_v50 = vadd.s32 896, %v2159_v44 }
 0x12e   : > { %v2149_v39 = vpop.f32.mrf.mxu0  ;;  %v2151_v40 = vpop.f32.mrf.mxu1 }
 0x12f   : > { %v1608_v41 = vpack.c.bf16 %v2149_v39, %v2143_v37  ;;  %v1609_v42 = vpack.c.bf16 %v2151_v40, %v2145_v38  ;;  %v1126_v54 = vmax.f32 %v1124_v51, %v2149_v39  ;;  %v1127_v3 = vmax.f32 %v1125_v53, %v2145_v38 }
 0x131   : > { %1056 = vst [vmem:[%s2117_s29 + $0x38] sm:$0xff] %v1608_v41  ;;  %1057 = vst [vmem:[%s2117_s29 + $0x40] sm:$0xff] %v1609_v42  ;;  %v1128_v63 = vmax.f32 %v1126_v54, %v2151_v40  ;;  %v2253_v41 = vadd.s32 512, %v2159_v44  ;;  %v2257_v42 = vadd.s32 640, %v2159_v44  ;;  %v2272_v54 = vadd.s32 1024, %v2159_v44 }
 0x148   : > { %v2174_v52 = vpop.f32.mrf.mxu0 }
 0x149   : > { %v1118_v61 = vmax.f32 %v1116_v56, %v2174_v52 }
 0x14a   : > { %v2179_v55 = vpop.f32.mrf.mxu0 }
 0x14b   : > { %v1605_v58 = vpack.c.bf16 %v2179_v55, %v2174_v52  ;;  %v2188_v59 = vsel %vm1091_vm1, %v2179_v55, -inf }
 0x14c   : > { %v2190_v60 = vpop.f32.mrf.mxu0  ;;  %v1119_v62 = vmax.f32 %v1117_v57, %v2188_v59 }
 0x14d   : > { %1053 = vst [vmem:[%s2117_s29 + $0x20] sm:$0xff] %v1605_v58  ;;  %v1129_v7 = vmax.f32 %v1127_v3, %v2190_v60 }
 0x14e   : > { %v2196_v1 = vpop.f32.mrf.mxu0  ;;  %v1120_v2 = vmax.f32 %v1118_v61, %v1119_v62 }
 0x14f   : > { %v1610_v4 = vpack.c.bf16 %v2196_v1, %v2190_v60  ;;  %v2204_v5 = vsel %vm1091_vm1, %v2196_v1, -inf }
 0x150   : > { %v1130_v6 = vmax.f32 %v1128_v63, %v2204_v5  ;;  %1121 = vmax.xlane.f32.xlu0 %v1120_v2 }
 0x151   : > { %1058 = vst [vmem:[%s2117_s29 + $0x48] sm:$0xff] %v1610_v4 }
 0x152   : > { %v1131_v8 = vmax.f32 %v1129_v7, %v1130_v6 }
 0x154   : > { %1132 = vmax.xlane.f32.xlu0 %v1131_v8 }
 0x16a   : > { %1252 = vperm.xlu0 %1687, %v1249_v9  }
 0x1d9   : > { %v1122_v12 = vpop.xlane.xlu0 %1121 }
 0x1da   : > { %v2222_v13 = vmax.f32 %v2219_v11, %v1122_v12 }
 0x1dc   : > { %v1138_v0 = vsub.f32 %v2219_v11, %v2222_v13  ;;  %1245 = vst.msk [vmem:[#allocation2] sm:$0xff] %vm279_vm0, %v2222_v13  ;;  %1150 = vperm.xlu1 %1686, %v2222_v13  }
 0x1dd   : > { %v1133_v15 = vpop.xlane.xlu0 %1132 }
 0x1de   : > { %v2232_v16 = vmax.f32 %v2224_v14, %v1133_v15 }
 0x1e0   : > { %v1139_v17 = vsub.f32 %v2224_v14, %v2232_v16  ;;  %1246 = vst.msk [vmem:[#allocation2 + $0x8] sm:$0xff] %vm279_vm0, %v2232_v16  ;;  %1155 = vperm.xlu1 %1686, %v2232_v16  }
 0x1e4   : > { %1255 = vperm.xlu1 %1686, %v1250_v18  }
 0x1e5   : > { %v1253_v24 = vpop.permute.xlu0 %1252 }
 0x1e6   : > { %vm1257_vm2 = vcmp.eq.s32.totalorder %v2159_v44, %v1253_v24  ;;  %vm1258_vm3 = vcmp.eq.s32.totalorder %v2240_v23, %v1253_v24  ;;  %vm1259_vm4 = vcmp.eq.s32.totalorder %v2243_v29, %v1253_v24  ;;  %vm1260_vm5 = vcmp.eq.s32.totalorder %v2248_v30, %v1253_v24 }
 0x1e7   : > { %v1277_v35 = vsel %vm1257_vm2, %v2101_v19, 0.0  ;;  %v1278_v36 = vsel %vm1258_vm3, %v2105_v21, 0.0  ;;  %v1279_v45 = vsel %vm1259_vm4, %v2103_v20, 0.0  ;;  %vm1261_vm6 = vcmp.eq.s32.totalorder %v2253_v41, %v1253_v24 }
 0x1e8   : > { %v1297_v43 = vadd.f32 %v1278_v36, %v1277_v35  ;;  %v1280_v49 = vsel %vm1260_vm5, %v2107_v22, 0.0  ;;  %vm1262_vm7 = vcmp.eq.s32.totalorder %v2257_v42, %v1253_v24  ;;  %v1281_v53 = vsel %vm1261_vm6, %v2131_v31, 0.0 }
 0x1e9   : > { %vm1263_vm8 = vcmp.eq.s32.totalorder %v2262_v46, %v1253_v24  ;;  %v1282_v57 = vsel %vm1262_vm7, %v2135_v33, 0.0  ;;  %vm1264_vm9 = vcmp.eq.s32.totalorder %v2267_v50, %v1253_v24  ;;  %vm1265_vm10 = vcmp.eq.s32.totalorder %v2272_v54, %v1253_v24 }
 0x1ea   : > { %v1298_v48 = vadd.f32 %v1297_v43, %v1279_v45  ;;  %v1283_v61 = vsel %vm1263_vm8, %v2133_v32, 0.0  ;;  %v1284_v63 = vsel %vm1264_vm9, %v2137_v34, 0.0  ;;  %vm1266_vm11 = vcmp.eq.s32.totalorder %v2166_v47, %v1253_v24 }
 0x1eb   : > { %v1285_v3 = vsel %vm1265_vm10, %v2174_v52, 0.0  ;;  %v1286_v6 = vsel %vm1266_vm11, %v2179_v55, 0.0 }
 0x1ec   : > { %v1299_v51 = vadd.f32 %v1298_v48, %v1280_v49 }
 0x1ee   : > { %v1300_v56 = vadd.f32 %v1299_v51, %v1281_v53 }
 0x1f0   : > { %v1301_v58 = vadd.f32 %v1300_v56, %v1282_v57 }
 0x1f2   : > { %v1302_v62 = vadd.f32 %v1301_v58, %v1283_v61 }
 0x1f4   : > { %v1303_v2 = vadd.f32 %v1302_v62, %v1284_v63 }
 0x1f6   : > { %v1304_v4 = vadd.f32 %v1303_v2, %v1285_v3 }
 0x1f8   : > { %v1305_v7 = vadd.f32 %v1304_v4, %v1286_v6 }
 0x1fa   : > { %1306 = vadd.xlane.f32.xlu0 %v1305_v7 }
 0x257   : > { %v1151_v8 = vpop.permute.xlu1 %1150 }
 0x258   : > { %v1158_v9 = vsub.f32 %v2101_v19, %v1151_v8  ;;  %v1159_v10 = vsub.f32 %v2105_v21, %v1151_v8  ;;  %v1160_v12 = vsub.f32 %v2103_v20, %v1151_v8  ;;  %v1161_v15 = vsub.f32 %v2107_v22, %v1151_v8 }
 0x259   : > { %v1162_v36 = vsub.f32 %v2131_v31, %v1151_v8  ;;  %v1163_v20 = vsub.f32 %v2135_v33, %v1151_v8  ;;  %v1164_v48 = vsub.f32 %v2133_v32, %v1151_v8  ;;  %v1165_v51 = vsub.f32 %v2137_v34, %v1151_v8 }
 0x25a   : > { %v1178_v18 = vmul.f32 1.442695, %v1158_v9  ;;  %v1180_v35 = vmul.f32 1.442695, %v1159_v10  ;;  %v1182_v43 = vmul.f32 1.442695, %v1160_v12  ;;  %v1166_v57 = vsub.f32 %v2174_v52, %v1151_v8 }
 0x25b   : > { %v2287_v24 = vpop.permute.xlu1 %1155  ;;  %v1184_v45 = vmul.f32 1.442695, %v1161_v15  ;;  %v1186_v49 = vmul.f32 1.442695, %v1162_v36  ;;  %v1188_v53 = vmul.f32 1.442695, %v1163_v20  ;;  %v1167_v58 = vsub.f32 %v2188_v59, %v1151_v8 }
 0x25c   : > { %1809 = vpow2.f32 %v1178_v18  ;;  %v1168_v55 = vsub.f32 %v2113_v25, %v2287_v24  ;;  %v1169_v19 = vsub.f32 %v2121_v27, %v2287_v24  ;;  %v1170_v31 = vsub.f32 %v2115_v26, %v2287_v24 }
 0x25d   : > { %1811 = vpow2.f32 %v1180_v35  ;;  %v1171_v33 = vsub.f32 %v2123_v28, %v2287_v24  ;;  %v1190_v32 = vmul.f32 1.442695, %v1164_v48  ;;  %v1172_v61 = vsub.f32 %v2143_v37, %v2287_v24 }
 0x25e   : > { %v1198_v21 = vmul.f32 1.442695, %v1168_v55  ;;  %v1200_v22 = vmul.f32 1.442695, %v1169_v19  ;;  %1813 = vpow2.f32 %v1182_v43  ;;  %v1202_v62 = vmul.f32 1.442695, %v1170_v31 }
 0x25f   : > { %1815 = vpow2.f32 %v1184_v45  ;;  %v2299_v56 = vpop.permute.xlu1 %1255  ;;  %v1192_v63 = vmul.f32 1.442695, %v1165_v51  ;;  %v1173_v34 = vsub.f32 %v2149_v39, %v2287_v24  ;;  %v1204_v52 = vmul.f32 1.442695, %v1171_v33 }
 0x260   : > { %1817 = vpow2.f32 %v1198_v21  ;;  %vm1267_vm12 = vcmp.eq.s32.totalorder %v2159_v44, %v2299_v56  ;;  %vm1268_vm13 = vcmp.eq.s32.totalorder %v2240_v23, %v2299_v56  ;;  %v1194_v2 = vmul.f32 1.442695, %v1166_v57 }
 0x261   : > { %1819 = vpow2.f32 %v1200_v22  ;;  %v1174_v59 = vsub.f32 %v2145_v38, %v2287_v24  ;;  %v1206_v3 = vmul.f32 1.442695, %v1172_v61  ;;  %v1287_v4 = vsel %vm1267_vm12, %v2113_v25, 0.0 }
 0x262   : > { %1821 = vpow2.f32 %v1186_v49  ;;  %v1288_v6 = vsel %vm1268_vm13, %v2121_v27, 0.0  ;;  %v1196_v44 = vmul.f32 1.442695, %v1167_v58  ;;  %vm1269_vm14 = vcmp.eq.s32.totalorder %v2243_v29, %v2299_v56 }
 0x263   : > { %1823 = vpow2.f32 %v1188_v53  ;;  %v1175_v8 = vsub.f32 %v2151_v40, %v2287_v24  ;;  %v1208_v9 = vmul.f32 1.442695, %v1173_v34  ;;  %v1176_v12 = vsub.f32 %v2190_v60, %v2287_v24 }
 0x264   : > { %1825 = vpow2.f32 %v1190_v32  ;;  %v1308_v25 = vadd.f32 %v1288_v6, %v1287_v4  ;;  %v1210_v27 = vmul.f32 1.442695, %v1174_v59  ;;  %vm1270_vm15 = vcmp.eq.s32.totalorder %v2248_v30, %v2299_v56 }
 0x265   : > { %1827 = vpow2.f32 %v1202_v62  ;;  %v1289_v29 = vsel %vm1269_vm14, %v2115_v26, 0.0  ;;  %v1177_v55 = vsub.f32 %v2204_v5, %v2287_v24  ;;  %v1212_v19 = vmul.f32 1.442695, %v1175_v8 }
 0x266   : > { %1829 = vpow2.f32 %v1192_v63  ;;  %v1309_v36 = vadd.f32 %v1308_v25, %v1289_v29  ;;  %v1290_v21 = vsel %vm1270_vm15, %v2123_v28, 0.0  ;;  %v1214_v48 = vmul.f32 1.442695, %v1176_v12 }
 0x267   : > { %1831 = vpow2.f32 %v1204_v52  ;;  %vm1271_vm1 = vcmp.eq.s32.totalorder %v2253_v41, %v2299_v56  ;;  %v1216_v31 = vmul.f32 1.442695, %v1177_v55  ;;  %vm1272_vm2 = vcmp.eq.s32.totalorder %v2257_v42, %v2299_v56 }
 0x268   : > { %1833 = vpow2.f32 %v1194_v2  ;;  %v1310_v26 = vadd.f32 %v1309_v36, %v1290_v21  ;;  %v1291_v5 = vsel %vm1271_vm1, %v2143_v37, 0.0  ;;  %v1292_v62 = vsel %vm1272_vm2, %v2149_v39, 0.0 }
 0x269   : > { %v1810_v7 = vpop.eup %1809  ;;  %1835 = vpow2.f32 %v1206_v3  ;;  %vm1273_vm3 = vcmp.eq.s32.totalorder %v2262_v46, %v2299_v56  ;;  %vm1274_vm4 = vcmp.eq.s32.totalorder %v2267_v50, %v2299_v56  ;;  %vm1275_vm5 = vcmp.eq.s32.totalorder %v2272_v54, %v2299_v56 }
 0x26a   : > { %v1812_v23 = vpop.eup %1811  ;;  %1837 = vpow2.f32 %v1196_v44  ;;  %v1311_v28 = vadd.f32 %v1310_v26, %v1291_v5  ;;  %v1293_v6 = vsel %vm1273_vm3, %v2145_v38, 0.0  ;;  %v1294_v46 = vsel %vm1274_vm4, %v2151_v40, 0.0 }
 0x26b   : > { %v1218_v10 = vadd.f32 %v1812_v23, %v1810_v7  ;;  %v1814_v15 = vpop.eup %1813  ;;  %1839 = vpow2.f32 %v1208_v9  ;;  %vm1276_vm6 = vcmp.eq.s32.totalorder %v2166_v47, %v2299_v56 }
 0x26c   : > { %v1816_v18 = vpop.eup %1815  ;;  %1841 = vpow2.f32 %v1210_v27  ;;  %v1312_v37 = vadd.f32 %v1311_v28, %v1292_v62  ;;  %v1247_v27 = vld [vmem:[#allocation4] sm:$0xff]  ;;  %v1296_v54 = vsel %vm1276_vm6, %v2196_v1, 0.0 }
 0x26d   : > { %v1219_v35 = vadd.f32 %v1814_v15, %v1218_v10  ;;  %v1818_v43 = vpop.eup %1817  ;;  %1843 = vpow2.f32 %v1212_v19  ;;  %v1295_v15 = vsel %vm1275_vm5, %v2190_v60, 0.0 }
 0x26e   : > { %v1820_v45 = vpop.eup %1819  ;;  %1845 = vpow2.f32 %v1214_v48  ;;  %v1313_v44 = vadd.f32 %v1312_v37, %v1293_v6 }
 0x26f   : > { %v1220_v20 = vadd.f32 %v1816_v18, %v1219_v35  ;;  %v1822_v22 = vpop.eup %1821  ;;  %v1229_v51 = vadd.f32 %v1820_v45, %v1818_v43  ;;  %1847 = vpow2.f32 %v1216_v31 }
 0x270   : > { %v1824_v49 = vpop.eup %1823  ;;  %v1314_v10 = vadd.f32 %v1313_v44, %v1294_v46 }
 0x271   : > { %v1221_v30 = vadd.f32 %v1822_v22, %v1220_v20  ;;  %v1826_v24 = vpop.eup %1825 }
 0x272   : > { %v1828_v33 = vpop.eup %1827  ;;  %v1315_v40 = vadd.f32 %v1314_v10, %v1295_v15 }
 0x273   : > { %v1222_v53 = vadd.f32 %v1824_v49, %v1221_v30  ;;  %v1830_v32 = vpop.eup %1829  ;;  %v1230_v41 = vadd.f32 %v1828_v33, %v1229_v51 }
 0x274   : > { %v1832_v58 = vpop.eup %1831  ;;  %v1316_v35 = vadd.f32 %v1315_v40, %v1296_v54 }
 0x275   : > { %v1223_v57 = vadd.f32 %v1826_v24, %v1222_v53  ;;  %v1834_v63 = vpop.eup %1833  ;;  %v1231_v34 = vadd.f32 %v1832_v58, %v1230_v41 }
 0x276   : > { %v1836_v52 = vpop.eup %1835 }
 0x277   : > { %v1224_v61 = vadd.f32 %v1830_v32, %v1223_v57  ;;  %v1838_v59 = vpop.eup %1837  ;;  %v1232_v42 = vadd.f32 %v1836_v52, %v1231_v34 }
 0x278   : > { %v1840_v3 = vpop.eup %1839 }
 0x279   : > { %v1225_v2 = vadd.f32 %v1834_v63, %v1224_v61  ;;  %v1233_v7 = vadd.f32 %v1840_v3, %v1232_v42  ;;  %v1842_v39 = vpop.eup %1841 }
 0x27a   : > { %v1844_v8 = vpop.eup %1843 }
 0x27b   : > { %v1226_v4 = vadd.f32 %v1838_v59, %v1225_v2  ;;  %v1234_v23 = vadd.f32 %v1842_v39, %v1233_v7  ;;  %v1846_v12 = vpop.eup %1845 }
 0x27c   : > { %v1848_v25 = vpop.eup %1847 }
 0x27d   : > { %1227 = vadd.xlane.f32.xlu1 %v1226_v4  ;;  %v1235_v9 = vadd.f32 %v1844_v8, %v1234_v23 }
 0x27f   : > { %v1236_v38 = vadd.f32 %v1846_v12, %v1235_v9 }
 0x281   : > { %v1237_v50 = vadd.f32 %v1848_v25, %v1236_v38 }
 0x283   : > { %1238 = vadd.xlane.f32.xlu1 %v1237_v50  ;;  %v1307_v29 = vpop.xlane.xlu0 %1306 }
 0x284   : > { %v1319_v18 = vadd.f32 %v1307_v29, %v1247_v27 }
 0x286   : > { %1321 = vst.msk [vmem:[#allocation4] sm:$0xff] %vm279_vm0, %v1319_v18 }
 0x287   : > { %1317 = vadd.xlane.f32.xlu1 %v1316_v35 }
 0x288   : > { %1896 = shalt.err (!%p1893_p3)
}
 0x289   : > { %s1897_s24 = scalar_lea.hbm %s2355_s13, 1280  ;;  %s1901_s6 = scalar_lea.hbm %s2423_s3, 2560 }
 0x28a   : > { %p1898_p5 = scmp.ne.s32.totalorder %s2355_s13, %s1897_s24  ;;  %p1902_p9 = scmp.lt.s32.totalorder %s2355_s13, %s2423_s3 }
 0x28b   : > { %p1903_p10 = scmp.lt.s32.totalorder %s1901_s6, %s1897_s24 }
 0x28c   : > { %p1899_p6 = pnand %p1898_p5, %p2039_p4 }
 0x28d   : > { %p1904_p11 = por %p1903_p10, %p1902_p9 }
 0x28e   : > { %p1900_p7 = pneg %p1899_p6 }
 0x290   : > { %p1905_p12 = pnand %p1904_p11, %p1900_p7 }
 0x292   : > { %1908 = shalt.err (!%p1905_p12)
}
 0x293   : > { %s1972_s10 = smov 640   ;;  %s1973_s11 = smov 40   ;;  %v1140_v47 = vmul.f32 1.442695, %v1138_v0  ;;  %v1142_v60 = vmul.f32 1.442695, %v1139_v17 }
 0x294   : > { %1617 = dma.vmem_to_hbm [thread:$0]  (%p2039_p4), %s2350_s9, 1280, %s2355_s13, %s2359_s14, %s1972_s10, %s1972_s10, %s1973_s11   ;;  %v1144_v56 = vld [vmem:[#allocation3] sm:$0xff]  ;;  %v1145_v45 = vld [vmem:[#allocation3 + $0x8] sm:$0xff]  ;;  %v1248_v0 = vld [vmem:[#allocation4 + $0x8] sm:$0xff] }
 0x295   : > { %1849 = vpow2.f32 %v1140_v47  ;;  %v1326_v26 = vld [vmem:[#allocation2] sm:$0xff]  ;;  %s272_s13 = scalar_lea.vmem %s2424_s4, %s1502_s30  ;;  %v1327_v5 = vld [vmem:[#allocation2 + $0x8] sm:$0xff] }
 0x296   : > { %1851 = vpow2.f32 %v1142_v60  ;;  %v1336_v49 = vld [vmem:[#allocation4] sm:$0xff] }
 0x2a2   : > { %v1850_v1 = vpop.eup %1849 }
 0x2a3   : > { %v1146_v36 = vmul.f32 %v1850_v1, %v1144_v56  ;;  %v1852_v19 = vpop.eup %1851 }
 0x2a4   : > { %v1147_v20 = vmul.f32 %v1852_v19, %v1145_v45 }
 0x306   : > { %v1228_v43 = vpop.xlane.xlu1 %1227 }
 0x307   : > { %v1240_v55 = vadd.f32 %v1228_v43, %v1146_v36 }
 0x309   : > { %1243 = vst.msk [vmem:[#allocation3] sm:$0xff] %vm279_vm0, %v1240_v55 }
 0x30c   : > { %v1239_v21 = vpop.xlane.xlu1 %1238 }
 0x30d   : > { %v1241_v13 = vadd.f32 %v1239_v21, %v1147_v20 }
 0x30f   : > { %1244 = vst.msk [vmem:[#allocation3 + $0x8] sm:$0xff] %vm279_vm0, %v1241_v13 }
 0x310   : > { %v1328_v11 = vld [vmem:[#allocation3] sm:$0xff]  ;;  %v1318_v14 = vpop.xlane.xlu1 %1317 }
 0x311   : > { %1853 = vlog2.f32 %v1328_v11  ;;  %v1320_v16 = vadd.f32 %v1318_v14, %v1248_v0 }
 0x313   : > { %1322 = vst.msk [vmem:[#allocation4 + $0x8] sm:$0xff] %vm279_vm0, %v1320_v16 }
 0x316   : > { %v1329_v17 = vld [vmem:[#allocation3 + $0x8] sm:$0xff] }
 0x317   : > { %1855 = vlog2.f32 %v1329_v17 }
 0x31a   : > { %v1337_v28 = vld [vmem:[#allocation4 + $0x8] sm:$0xff] }
 0x31e   : > { %v1854_v22 = vpop.eup %1853 }
 0x31f   : > { %v1331_v48 = vmul.f32 0.6931472, %v1854_v22 }
 0x321   : > { %v1334_v30 = vadd.f32 %v1331_v48, %v1326_v26 }
 0x323   : > { %v1338_v31 = vsub.f32 %v1334_v30, %v1336_v49 }
 0x324   : > { %v1856_v51 = vpop.eup %1855 }
 0x325   : > { %1340 = vst.msk [vmem:[%s272_s13] sm:$0xff] %vm279_vm0, %v1338_v31  ;;  %v1333_v53 = vmul.f32 0.6931472, %v1856_v51 }
 0x327   : > { %v1335_v24 = vadd.f32 %v1333_v53, %v1327_v5 }
 0x329   : > { %v1339_v33 = vsub.f32 %v1335_v24, %v1337_v28 }
 0x32b   : > { %1341 = vst.msk [vmem:[%s272_s13 + $0x8] sm:$0xff] %vm279_vm0, %v1339_v33 }
 0x32c PF: > { %p1629_p4 = scmp.ge.s32.totalorder %s1963_s20, 2  ;;  %s1383_s12 = sand.u32 1, %s1943_s15  }
 0x32d   : > { %s1384_s30 = scalar_lea.sflag [#allocation7], %s1383_s12 }
 0x32e   : > { %p1624_p13 = pnand %p1629_p4, %p2046_p8 }
 0x330   : > { %p1625_p0 = pneg %p1624_p13 }
 0x332   : > { %1938 = dma.done.wait (%p1625_p0), %s1384_s30, 1280  }
 0x333   : > { %1940 = vsyncadd (%p1625_p0), %s1384_s30, 4294966016  ;;  %s19_s20 = sadd.s32 1, %s1963_s20   ;;  %s2429_s15 = smov %s1947_s16 }
 0x334   : > { %p16_p1 = scmp.ge.s32.totalorder %s19_s20, 4   ;;  %s2430_s16 = smov %s1951_s17 }
 0x335   : > { %s2431_s17 = smov %s2052_s28  ;;  %s2432_s18 = smov %s1959_s19 }
 0x336   : > { %s2433_s19 = smov %s2435_s23  ;;  %18 = sbr.rel (!%p16_p1) target bundleno = 5 (0x5), region = 96 }
 0x33b   :  { %1397 = vsyncpa [#allocation6], 1 }
 0x33c   :  { %1399 = vsyncpa [#allocation6 + $0x1], 1 }
 0x33d   :  { %1400 = vsyncpa [#allocation7], 1 }
 0x33e   :  { %1402 = vsyncpa [#allocation7 + $0x1], 1 }

</bundles_post_ra>
